<compile_context>
chip_gen: v6e
topology: v6e:2x2x1
jax: 0.10.0
libtpu: 0.0.40
codegen_flags: <defaults>
</compile_context>

<pallas_src>
import jax
import jax.numpy as jnp
from jax.experimental import pallas as pl
from jax.experimental.pallas import tpu as pltpu

# Registered buffers of the PyTorch module (fixed constants).
_NORM_W = (38.43190559738741, -50.05233847007584, 25.07626762013403, 3.1930363795157106)
_NORM_BIAS = 48.95299158714191


def _normalisation(m):
    """norm = addmm(bias, [m, e^m, m^2, (e^m)^2], W), computed element-wise (VPU + EUP)."""
    em = jnp.exp(m)
    return (_NORM_W[0] * m + _NORM_W[1] * em
            + _NORM_W[2] * (m * m) + _NORM_W[3] * (em * em) + _NORM_BIAS)


def _fwd_sum_kernel(mod_ref, wfilt_ref, xt_ref, o_ref):
    # mod_ref:   (1, N)  f32   filter moduli
    # wfilt_ref: (F, N)  f32   synthetic filter-bank weights
    # xt_ref:    (F, Tm)       input tile, M = T*B on the lane axis
    # o_ref:     (1, Tm) f32   y tile (filters already summed)
    norm = _normalisation(mod_ref[...])                               # (1, N)
    # Fold normalisation into the filter bank: w_eff[f] = sum_n w_filt[f, n] * norm[n]
    w_eff = jnp.sum(wfilt_ref[...] * norm, axis=1, keepdims=True)     # (F, 1)
    x = xt_ref[...].astype(jnp.float32)                               # (F, Tm)
    o_ref[...] = jnp.sum(x * w_eff, axis=0, keepdims=True)            # (1, Tm)


def _fwd_nosum_kernel(mod_ref, wfiltT_ref, xt_ref, o_ref):
    # mod_ref:    (N, 1) f32
    # wfiltT_ref: (N, F) f32   (w_filt transposed in the wrapper -> no in-kernel transpose)
    # xt_ref:     (F, Tm)
    # o_ref:      (N, Tm) f32  per-filter normalized outputs
    norm = _normalisation(mod_ref[...])                               # (N, 1)
    w_effT = wfiltT_ref[...] * norm                                   # (N, F)
    x = xt_ref[...].astype(jnp.float32)                               # (F, Tm)
    num_f = x.shape[0]                                                # static, tiny
    acc = w_effT[:, 0:1] * x[0:1, :]                                  # (N, Tm) outer product
    for f in range(1, num_f):                                         # static unrolled loop
        acc = acc + w_effT[:, f:f + 1] * x[f:f + 1, :]
    o_ref[...] = acc


def _pick_tile_m(M, cap):
    cap = max(128, (cap // 128) * 128)
    if M <= cap:
        return M          # full extent -> always a legal block
    return cap            # multiple of 128; ragged tail handled by Pallas masking


def base_model_forward(x, w_filt, modulus, sum_filters=True, tile_m=32768):
    """Fused Pallas forward.

    x:       (T, B, F)  input features (seq-first, like pad_packed_sequence output)
    w_filt:  (F, N)     synthetic linear filter bank (stand-in for abstract self.filters)
    modulus: (N,)       filter moduli (out[2] of the filters)
    """
    T, B, F = x.shape
    N = w_filt.shape[1]
    M = T * B

    # Layout plumbing (outside the kernel): put the large axis on lanes -> lane-dense
    # tiles and unmasked stores. One cheap XLA transpose of x; out0 is never built.
    xt = jnp.transpose(x.reshape(M, F))                               # (F, M)
    tm = _pick_tile_m(M, tile_m)
    grid = (pl.cdiv(M, tm),)

    if sum_filters:
        kernel = _fwd_sum_kernel
        mod_in = modulus.astype(jnp.float32).reshape(1, N)
        w_in = w_filt.astype(jnp.float32)                             # (F, N)
        out_rows = 1
        aux_specs = [
            pl.BlockSpec((1, N), lambda i: (0, 0)),
            pl.BlockSpec((F, N), lambda i: (0, 0)),
        ]
    else:
        kernel = _fwd_nosum_kernel
        mod_in = modulus.astype(jnp.float32).reshape(N, 1)
        w_in = jnp.transpose(w_filt).astype(jnp.float32)              # (N, F)
        out_rows = N
        aux_specs = [
            pl.BlockSpec((N, 1), lambda i: (0, 0)),
            pl.BlockSpec((N, F), lambda i: (0, 0)),
        ]

    y2d = pl.pallas_call(
        kernel,
        out_shape=jax.ShapeDtypeStruct((out_rows, M), jnp.float32),
        grid=grid,
        in_specs=aux_specs + [pl.BlockSpec((F, tm), lambda i: (0, i))],
        out_specs=pl.BlockSpec((out_rows, tm), lambda i: (0, i)),
        compiler_params=pltpu.CompilerParams(
            dimension_semantics=("parallel",),       # megacore-sharded on v7x, neutral on v5e/v6e
            vmem_limit_bytes=32 * 1024 * 1024,       # safe on v5e/v6e/v7x; tiles are small
        ),
    )(mod_in, w_in, xt)

    if sum_filters:
        return y2d.reshape(T, B, 1)
    return jnp.transpose(y2d).reshape(T, B, N)


def base_model_forward_ref(x, w_filt, modulus, sum_filters=True):
    """Pure-JAX mirror of the PyTorch BaseModel.forward (materializes out0), for checking."""
    out0 = jnp.einsum("tbf,fn->tbn", x.astype(jnp.float32), w_filt.astype(jnp.float32))
    m = modulus.astype(jnp.float32)
    em = jnp.exp(m)
    feats = jnp.stack([m, em, m * m, em * em], axis=1)                # (N, 4)
    w = jnp.asarray(_NORM_W, jnp.float32).reshape(4, 1)
    norm = (feats @ w + _NORM_BIAS).reshape(1, 1, -1)                 # (1, 1, N)
    y = out0 * norm
    return jnp.sum(y, axis=-1, keepdims=True) if sum_filters else y


if __name__ == "__main__":
    # TODO(synk): the real filter bank lives in subclasses (self.filters is None in BaseModel);
    # a deterministic linear filter bank is used here, with its matmul folded into the kernel.
    T, B, F, N = 128, 8, 3, 4     # seq len, batch, input feats, num filters (len(thetas))

    key = jax.random.PRNGKey(0)
    k_x, k_w, k_m = jax.random.split(key, 3)
    x = jax.random.normal(k_x, (T, B, F), dtype=jnp.float32)
    w_filt = jax.random.normal(k_w, (F, N), dtype=jnp.float32) * 0.5
    modulus = jax.random.normal(k_m, (N,), dtype=jnp.float32) * 0.1

    # Default forward (sum_filters=True); small tile to exercise the multi-step pipelined grid.
    y = jax.block_until_ready(base_model_forward(x, w_filt, modulus, True, tile_m=256))
    y_ref = base_model_forward_ref(x, w_filt, modulus, True)
    assert y.shape == (T, B, 1)
    assert jnp.allclose(y, y_ref, rtol=1e-4, atol=1e-4)

    # Same path with the default (large) tile cap -> single full-extent tile.
    y1 = jax.block_until_ready(base_model_forward(x, w_filt, modulus, True))
    assert jnp.allclose(y1, y_ref, rtol=1e-4, atol=1e-4)

    # filters_forward path (sum_filters=False).
    y2 = jax.block_until_ready(base_model_forward(x, w_filt, modulus, False, tile_m=512))
    y2_ref = base_model_forward_ref(x, w_filt, modulus, False)
    assert y2.shape == (T, B, N)
    assert jnp.allclose(y2, y2_ref, rtol=1e-4, atol=1e-4)

    print("KERNEL_OK")
</pallas_src>

<mosaic_0001>
module attributes {stable_mosaic.version = 11 : i64} {
  func.func @_fwd_sum_kernel(%arg0: i32, %arg1: memref<1x4xf32, #tpu.memory_space<vmem>>, %arg2: memref<3x4xf32, #tpu.memory_space<vmem>>, %arg3: memref<3x256xf32, #tpu.memory_space<vmem>>, %arg4: memref<1x256xf32, #tpu.memory_space<vmem>>) attributes {dimension_semantics = [#tpu.dimension_semantics<parallel>], iteration_bounds = array<i64: 4>, scalar_prefetch = 0 : i64, scratch_operands = 0 : i64, tpu.core_type = #tpu.core_type<tc>, window_params = [{pipeline_mode = #tpu.pipeline_mode<synchronous>, transform_indices = @transform_0, window_bounds = array<i64: 1, 4>}, {pipeline_mode = #tpu.pipeline_mode<synchronous>, transform_indices = @transform_1, window_bounds = array<i64: 3, 4>}, {transform_indices = @transform_2, window_bounds = array<i64: 3, 256>}, {transform_indices = @transform_3, window_bounds = array<i64: 1, 256>}]} {
    %c0 = arith.constant 0 : index
    %c0_0 = arith.constant 0 : index
    %0 = vector.load %arg1[%c0, %c0_0] : memref<1x4xf32, #tpu.memory_space<vmem>>, vector<1x4xf32>
    %1 = math.exp %0 : vector<1x4xf32>
    %cst = arith.constant 38.4319038 : f32
    %2 = vector.broadcast %cst : f32 to vector<1x4xf32>
    %3 = arith.mulf %2, %0 : vector<1x4xf32>
    %cst_1 = arith.constant -50.0523376 : f32
    %4 = vector.broadcast %cst_1 : f32 to vector<1x4xf32>
    %5 = arith.mulf %4, %1 : vector<1x4xf32>
    %6 = arith.addf %3, %5 : vector<1x4xf32>
    %7 = arith.mulf %0, %0 : vector<1x4xf32>
    %cst_2 = arith.constant 25.0762672 : f32
    %8 = vector.broadcast %cst_2 : f32 to vector<1x4xf32>
    %9 = arith.mulf %8, %7 : vector<1x4xf32>
    %10 = arith.addf %6, %9 : vector<1x4xf32>
    %11 = arith.mulf %1, %1 : vector<1x4xf32>
    %cst_3 = arith.constant 3.19303632 : f32
    %12 = vector.broadcast %cst_3 : f32 to vector<1x4xf32>
    %13 = arith.mulf %12, %11 : vector<1x4xf32>
    %14 = arith.addf %10, %13 : vector<1x4xf32>
    %cst_4 = arith.constant 48.9529915 : f32
    %15 = vector.broadcast %cst_4 : f32 to vector<1x4xf32>
    %16 = arith.addf %14, %15 : vector<1x4xf32>
    %c0_5 = arith.constant 0 : index
    %c0_6 = arith.constant 0 : index
    %17 = vector.load %arg2[%c0_5, %c0_6] : memref<3x4xf32, #tpu.memory_space<vmem>>, vector<3x4xf32>
    %18 = vector.broadcast %16 : vector<1x4xf32> to vector<3x4xf32>
    %19 = arith.mulf %17, %18 : vector<3x4xf32>
    %cst_7 = arith.constant dense<0.000000e+00> : vector<3xf32>
    %20 = vector.multi_reduction <add>, %19, %cst_7 [1] : vector<3x4xf32> to vector<3xf32>
    %21 = vector.shape_cast %20 : vector<3xf32> to vector<3x1xf32>
    %c0_8 = arith.constant 0 : index
    %c0_9 = arith.constant 0 : index
    %22 = vector.load %arg3[%c0_8, %c0_9] : memref<3x256xf32, #tpu.memory_space<vmem>>, vector<3x256xf32>
    %23 = vector.broadcast %21 : vector<3x1xf32> to vector<3x256xf32>
    %24 = arith.mulf %22, %23 : vector<3x256xf32>
    %cst_10 = arith.constant dense<0.000000e+00> : vector<256xf32>
    %25 = vector.multi_reduction <add>, %24, %cst_10 [0] : vector<3x256xf32> to vector<256xf32>
    %26 = vector.shape_cast %25 : vector<256xf32> to vector<1x256xf32>
    %c0_11 = arith.constant 0 : index
    %c0_12 = arith.constant 0 : index
    %27 = vector.load %arg4[%c0_11, %c0_12] : memref<1x256xf32, #tpu.memory_space<vmem>>, vector<1x256xf32>
    tpu.vector_store %arg4[%c0_11, %c0_12], %26 {strides = array<i32>} : memref<1x256xf32, #tpu.memory_space<vmem>>, vector<1x256xf32>,
    return
  }
  func.func @transform_0(%arg0: i32) -> (i32, i32) {
    %c0_i32 = arith.constant 0 : i32
    %c0_i32_0 = arith.constant 0 : i32
    %c0_i32_1 = arith.constant 0 : i32
    return %c0_i32, %c0_i32_0 : i32, i32
  }
  func.func @transform_1(%arg0: i32) -> (i32, i32) {
    %c0_i32 = arith.constant 0 : i32
    %c0_i32_0 = arith.constant 0 : i32
    %c0_i32_1 = arith.constant 0 : i32
    return %c0_i32, %c0_i32_0 : i32, i32
  }
  func.func @transform_2(%arg0: i32) -> (i32, i32) {
    %c0_i32 = arith.constant 0 : i32
    %c0_i32_0 = arith.constant 0 : i32
    return %c0_i32, %arg0 : i32, i32
  }
  func.func @transform_3(%arg0: i32) -> (i32, i32) {
    %c0_i32 = arith.constant 0 : i32
    %c0_i32_0 = arith.constant 0 : i32
    return %c0_i32, %arg0 : i32, i32
  }
}

</mosaic_0001>

<bundles_post_ra>
// kernel: tpu_custom_call.1
= control target key start
LH: loop header
LB: loop body
LE: loop exit
PB: predicated region body
PF: predicated region fallthrough
CT: control target
= control target key end

     0   :  { %8 = vsyncpa [#allocation3], 0  ;;  %s836_s0 = inlined_call_operand.hbm [shape: f32[1,4], index: 0, kind: input, shape index: {}]   ;;  %s837_s1 = inlined_call_operand.hbm [shape: f32[3,4], index: 1, kind: input, shape index: {}]   ;;  %s838_s2 = inlined_call_operand.hbm [shape: f32[3,1024], index: 2, kind: input, shape index: {}]   ;;  %s839_s3 = inlined_call_operand.hbm [shape: f32[1,1024], index: 3, kind: output, shape index: {}]  }
   0x1   :  { %9 = vsyncpa [#allocation6], 0 }
   0x2   :  { %10 = vsyncpa [#allocation4], 0 }
   0x3   :  { %12 = vsyncpa [#allocation4 + $0x1], 0  ;;  %s664_s12 = smov 0   ;;  %s666_s13 = smov 0  }
   0x4   :  { %s668_s14 = smov 0   ;;  %s670_s15 = smov 0  }
   0x5 LB: > { %s685_s16 = sadd.s32 4294967295, %s636_s15   ;;  %s393_s17 = sadd.s32 4294967294, %s636_s15   ;;  %s636_s15 = sphi %s670_s15, %s862_s15   ;;  %s632_s14 = sphi %s668_s14, %s861_s14   ;;  %s628_s13 = sphi %s666_s13, %s860_s13   ;;  %s624_s12 = sphi %s664_s12, %s859_s12  }
   0x6   : > { %p80_p0 = scmp.ne.s32.totalorder %s628_s13, %s624_s12  ;;  %p840_p1 = scmp.eq.s32.totalorder %s685_s16, 0 }
   0x7   : > { %p110_p3 = scmp.eq.s32.totalorder %s393_s17, 3  ;;  %p394_p5 = scmp.ge.s32.totalorder %s636_s15, 1 }
   0x8   : > { %p694_p4 = por %p840_p1, %p80_p0  ;;  %p117_p7 = scmp.lt.s32.totalorder %s636_s15, 5 }
   0x9   : > { %p699_p6 = por %p110_p3, %p80_p0  ;;  %s638_s21 = smov [#allocation2]  }
   0xa   : > { %s844_s18 = scalar_select %p694_p4, 1, 0 }
   0xb   : > { %s845_s19 = scalar_select %p699_p6, 1, 0 }
   0xc   : > { %p704_p8 = pnand %p394_p5, %p117_p7  ;;  %s130_s22 = sshll.u32 %s638_s21, 4  ;;  %s131_s22 = int_to_ptr.vmem [resolvable:$true] %s130_s22 }
   0xd   : > { %s639_s23 = smov [#allocation5]   ;;  %s717_s26 = sadd.s32 1, %s636_s15  }
   0xe   : > { %s846_s20 = scalar_select %p704_p8, 1, 0 }
   0xf   : > { %p425_p9 = pneg %p704_p8  ;;  %s141_s24 = sshll.u32 %s639_s23, 4  ;;  %s142_s24 = int_to_ptr.vmem [resolvable:$true] %s141_s24 }
  0x10   : > { %s64_s27 = ssub.s32 %s636_s15, %s717_s26  ;;  %s495_s28 = scalar_lea.vmem %s131_s22, 16 }
  0x11   : > { %p712_p10 = pnand %p425_p9, %p840_p1  ;;  %p496_p12 = scmp.ne.s32.totalorder %s131_s22, %s495_s28 }
  0x12   : > { %s502_s29 = scalar_lea.vmem %s131_s22, 32  ;;  %p503_p3 = scmp.lt.s32.totalorder %s131_s22, %s131_s22 }
  0x13   : > { %p486_p11 = pneg %p712_p10  ;;  %p504_p5 = scmp.lt.s32.totalorder %s502_s29, %s495_s28 }
  0x15   : > { %p498_p13 = pnand %p496_p12, %p486_p11  ;;  %p505_p7 = por %p504_p5, %p503_p3 }
  0x17   : > { %p499_p0 = pneg %p498_p13 }
  0x19   : > { %p506_p9 = pnand %p505_p7, %p499_p0 }
  0x1b   : > { %509 = shalt.err (!%p506_p9)
}
  0x1c   : > { %428 = dma.hbm_to_vmem [thread:$0]  (!%p712_p10), %s836_s0, 16, %s131_s22, [#allocation3]  }
  0x1d   : > { %s521_s5 = scalar_lea.vmem %s142_s24, 64  ;;  %p529_p13 = scmp.lt.s32.totalorder %s142_s24, %s142_s24 }
  0x1e   : > { %p522_p1 = scmp.ne.s32.totalorder %s142_s24, %s521_s5  ;;  %p530_p6 = scmp.lt.s32.totalorder %s521_s5, %s521_s5 }
  0x20   : > { %p524_p2 = pnand %p522_p1, %p486_p11  ;;  %p531_p4 = por %p530_p6, %p529_p13 }
  0x22   : > { %p525_p12 = pneg %p524_p2 }
  0x24   : > { %p532_p8 = pnand %p531_p4, %p525_p12 }
  0x26   : > { %535 = shalt.err (!%p532_p8)
}
  0x27   : > { %431 = dma.hbm_to_vmem [thread:$0]  (!%p712_p10), %s837_s1, 64, %s142_s24, [#allocation6]  }
  0x28   : > { %p65_p1 = scmp.eq.s32.totalorder %s64_s27, 0  ;;  %s67_s8 = sadd.s32 1, %s632_s14 }
  0x29   : > { %p74_p2 = scmp.ne.s32.totalorder %s632_s14, %s628_s13  ;;  %p75_p4 = scmp.eq.s32.totalorder %s636_s15, 0 }
  0x2a   : > { %s744_s9 = scalar_select %p65_p1, %s632_s14, %s67_s8  }
  0x2b   : > { %p76_p6 = por %p75_p4, %p74_p2  ;;  %p848_p8 = scmp.eq.s32.totalorder %s685_s16, 3 }
  0x2c   : > { %p442_p0 = scmp.lt.s32.totalorder %s636_s15, 4  ;;  %s152_s11 = sand.u32 1, %s636_s15  }
  0x2d   : > { %p748_p11 = por %p848_p8, %p74_p2  ;;  %s154_s17 = sand.u32 1, %s632_s14  }
  0x2e   : > { %s398_s21 = sshll.u32 %s154_s17, 3  ;;  %s411_s22 = sshll.u32 %s636_s15, 7 }
  0x2f   : > { %s849_s10 = scalar_select %p748_p11, 1, 0 }
  0x30   : > { %s759_s24 = scalar_lea.hbm %s838_s2, %s411_s22  ;;  %s156_s27 = scalar_lea.vmem [#allocation7], %s398_s21 }
  0x31   : > { %s164_s28 = sshll.u32 %s156_s27, 4  ;;  %p761_p10 = pnand %p442_p0, %p76_p6  ;;  %s165_s28 = int_to_ptr.vmem [resolvable:$true] %s164_s28 }
  0x32   : > { %s153_s30 = scalar_lea.sflag [#allocation3], %s152_s11  ;;  %s536_s4 = scalar_lea.hbm %s759_s24, 128 }
  0x33   : > { %p537_p3 = scmp.ne.s32.totalorder %s759_s24, %s536_s4  ;;  %p538_p5 = pneg %p761_p10 }
  0x34   : > { %s541_s7 = scalar_lea.hbm %s838_s2, 512  ;;  %p542_p12 = scmp.lt.s32.totalorder %s759_s24, %s838_s2 }
  0x35   : > { %p539_p7 = pnand %p538_p5, %p537_p3  ;;  %p543_p13 = scmp.lt.s32.totalorder %s541_s7, %s536_s4 }
  0x37   : > { %p540_p9 = pneg %p539_p7  ;;  %p544_p1 = por %p543_p13, %p542_p12 }
  0x39   : > { %p545_p2 = pnand %p544_p1, %p540_p9 }
  0x3b   : > { %548 = shalt.err (!%p545_p2)
}
  0x3c   : > { %s549_s21 = scalar_lea.vmem %s165_s28, 128  ;;  %s640_s11 = smov [#allocation7]  }
  0x3d   : > { %p550_p4 = scmp.ne.s32.totalorder %s165_s28, %s549_s21  ;;  %s554_s22 = sshll.u32 %s640_s11, 4  ;;  %s555_s22 = int_to_ptr.vmem [resolvable:$false] %s554_s22 }
  0x3e   : > { %s556_s23 = scalar_lea.vmem %s555_s22, 256  ;;  %p557_p0 = scmp.lt.s32.totalorder %s165_s28, %s555_s22 }
  0x3f   : > { %p552_p6 = pnand %p550_p4, %p538_p5  ;;  %p558_p3 = scmp.lt.s32.totalorder %s556_s23, %s549_s21 }
  0x41   : > { %p553_p8 = pneg %p552_p6  ;;  %p559_p7 = por %p558_p3, %p557_p0 }
  0x43   : > { %p560_p11 = pnand %p559_p7, %p553_p8 }
  0x45   : > { %563 = shalt.err (!%p560_p11)
}
  0x46   : > { %435 = dma.hbm_to_vmem [thread:$0]  (!%p761_p10), %s759_s24, 128, %s165_s28, %s153_s30  }
  0x47   : > { %p851_p9 = scmp.ne.s32.totalorder %s846_s20, 0 }
  0x48   : > { %p852_p12 = scmp.eq.s32.totalorder (!%p851_p9), %s685_s16, 0 }
  0x49   : > { %173 = sbr.rel (%p851_p9) target bundleno = 296 (0x128), region = 32 }
  0x4e   : > { %607 = dma.done.wait (%p852_p12), [#allocation3], 16   ;;  %p853_p5 = pmov %p852_p12 }
  0x50   : > { %609 = vsyncadd (%p853_p5), [#allocation3], 4294967280  ;;  %p854_p13 = pmov %p853_p5 }
  0x51   : > { %p855_p1 = pmov %p853_p5 }
  0x52   : > { %611 = dma.done.wait (%p854_p13), [#allocation6], 64  }
  0x53   : > { %613 = vsyncadd (%p855_p1), [#allocation6], 4294967232  ;;  %s183_s25 = sand.u32 1, %s685_s16   ;;  %s791_s24 = sand.u32 1, %s628_s13  }
  0x54   : > { %s404_s20 = sshll.u32 %s791_s24, 3  ;;  %s184_s27 = scalar_lea.sflag [#allocation3], %s183_s25 }
  0x55   : > { %s794_s28 = scalar_lea.vmem [#allocation7], %s404_s20  ;;  %p856_p11 = scmp.ne.s32.totalorder %s844_s18, 0 }
  0x57   : > { %615 = dma.done.wait (%p856_p11), %s184_s27, 128  }
  0x58   : > { %617 = vsyncadd (%p856_p11), %s184_s27, 4294967168  ;;  %v212_v0 = vld [vmem:[#allocation2] sm:$0x1]  ;;  %v227_v4 = vlaneseq  ;;  %v225_v16 = vld [vmem:[#allocation5] sm:$0x7]  ;;  %vm233_vm0 = vcmask 26624  }
  0x59   : > { %v213_v1 = vmul.f32 1.442695, %v212_v0  ;;  %v218_v2 = vmul.f32 %v212_v0, %v212_v0  ;;  %v215_v3 = vmul.f32 38.431904, %v212_v0  ;;  %v641_v20 = vmov 839922192  }
  0x5a   : > { %v228_v11 = vshrl.u32 %v227_v4, 7  ;;  %v240_v21 = vunpack.c.l.s4 %v641_v20  ;;  %v237_v25 = vld [vmem:[%s794_s28] sm:$0x77]  ;;  %vm251_vm1 = vcmask 1042432   ;;  %v642_v34 = vmov 1966171168  }
  0x5b   : > { %482 = vpow2.f32 %v213_v1  ;;  %v219_v7 = vmul.f32 25.076267, %v218_v2  ;;  %v270_v35 = vunpack.c.l.s4 %v642_v34  ;;  %s405_s18 = sshll.u32 %s791_s24, 1  ;;  %s412_s29 = sshll.u32 %s685_s16, 5  ;;  %vm286_vm2 = vcmp.lt.s32.totalorder %v227_v4, 256 }
  0x5c   : > { %v229_v14 = vsub.s32 0, %v228_v11  ;;  %v241_v22 = vunpack.c.0.s8 %v240_v21  ;;  %s209_s30 = scalar_lea.vmem [#allocation8], %s405_s18  ;;  %s302_s7 = scalar_lea.hbm %s839_s3, %s412_s29 }
  0x5d   : > { %v271_v40 = vunpack.c.0.s8 %v270_v35  ;;  %s304_s4 = sshll.u32 %s209_s30, 4  ;;  %s290_s8 = scalar_lea.sflag [#allocation4], %s791_s24  ;;  %s305_s4 = int_to_ptr.vmem [resolvable:$true] %s304_s4 }
  0x5e   : > { %v244_v23 = vsub.s32 %v241_v22, %v228_v11  ;;  %s564_s17 = scalar_lea.vmem %s305_s4, 32  ;;  %p857_p2 = scmp.ne.s32.totalorder %s849_s10, 0 }
  0x5f   : > { %v274_v44 = vsub.s32 %v271_v40, %v228_v11  ;;  %p565_p10 = scmp.ne.s32.totalorder %s305_s4, %s564_s17  ;;  %s643_s21 = smov [#allocation8]  }
  0x60   : > { %s568_s11 = sshll.u32 %s643_s21, 4  ;;  %s569_s11 = int_to_ptr.vmem [resolvable:$false] %s568_s11 }
  0x61   : > { %p566_p4 = pnand %p565_p10, %p857_p2  ;;  %s570_s16 = scalar_lea.vmem %s569_s11, 64 }
  0x62   : > { %p571_p8 = scmp.lt.s32.totalorder %s305_s4, %s569_s11  ;;  %p572_p0 = scmp.lt.s32.totalorder %s570_s16, %s564_s17 }
  0x63   : > { %p567_p6 = pneg %p566_p4 }
  0x64   : > { %p573_p3 = por %p572_p0, %p571_p8 }
  0x66   : > { %p574_p7 = pnand %p573_p3, %p567_p6 }
  0x68   : > { %v483_v5 = vpop.eup %482 }
  0x69   : > { %v216_v6 = vmul.f32 -50.052338, %v483_v5  ;;  %v221_v8 = vmul.f32 %v483_v5, %v483_v5 }
  0x6b   : > { %v217_v9 = vadd.f32 %v216_v6, %v215_v3  ;;  %v222_v10 = vmul.f32 3.1930363, %v221_v8 }
  0x6d   : > { %v220_v12 = vadd.f32 %v219_v7, %v217_v9 }
  0x6f   : > { %v223_v13 = vadd.f32 %v222_v10, %v220_v12 }
  0x71   : > { %v224_v15 = vadd.f32 48.95299, %v223_v13 }
  0x73   : > { %v230_v17 = vrot.slane %v224_v15, %v229_v14 }
  0x75   : > { %v232_v18 = vmul.f32 %v230_v17, %v225_v16 }
  0x77   : > { %v234_v19 = vsel %vm233_vm0, %v232_v18, 0.0 }
  0x78   : > { %235 = vadd.xlane.f32.xlu0 %v234_v19 }
 0x101   : > { %v236_v24 = vpop.xlane.xlu0 %235 }
 0x102   : > { %v245_v26 = vrot.slane %v236_v24, %v244_v23 }
 0x104   : > { %v247_v27 = vmul.f32 %v245_v26, %v237_v25 }
 0x106   : > { %v249_v28 = vcombine.high %v247_v27, %v247_v27  ;;  %v252_v29 = vsel %vm251_vm1, %v247_v27, 0.0 }
 0x107   : > { %v253_v30 = vrot.slane %v252_v29, 4 }
 0x108   : > { %v259_v31 = vsel %vm251_vm1, %v249_v28, 0.0 }
 0x109   : > { %v254_v32 = vadd.f32 %v253_v30, %v252_v29  ;;  %v260_v33 = vrot.slane %v259_v31, 4 }
 0x10b   : > { %v255_v36 = vrot.slane %v254_v32, 2  ;;  %v261_v37 = vadd.f32 %v260_v33, %v259_v31 }
 0x10d   : > { %v256_v38 = vadd.f32 %v255_v36, %v254_v32  ;;  %v262_v39 = vrot.slane %v261_v37, 2 }
 0x10f   : > { %v257_v41 = vrot.slane %v256_v38, 1  ;;  %v263_v42 = vadd.f32 %v262_v39, %v261_v37 }
 0x111   : > { %v264_v43 = vrot.slane %v263_v42, 1  ;;  %v258_v45 = vadd.f32 %v257_v41, %v256_v38 }
 0x113   : > { %v265_v46 = vadd.f32 %v264_v43, %v263_v42 }
 0x115   : > { %v268_v47 = vcombine.low %v258_v45, %v265_v46 }
 0x117   : > { %v275_v48 = vrot.slane %v268_v47, %v274_v44 }
 0x119   : > { %v282_v49 = vrot.slane %v275_v48, %v274_v44 }
 0x11b   : > { %288 = vst.msk [vmem:[%s209_s30] sm:$0x3] %vm286_vm2, %v282_v49 }
 0x11c   : > { %577 = shalt.err (!%p574_p7)
}
 0x11d   : > { %s578_s22 = scalar_lea.hbm %s302_s7, 32  ;;  %s582_s24 = scalar_lea.hbm %s839_s3, 128 }
 0x11e   : > { %p579_p9 = scmp.ne.s32.totalorder %s302_s7, %s578_s22  ;;  %p583_p13 = scmp.lt.s32.totalorder %s302_s7, %s839_s3 }
 0x11f   : > { %p584_p1 = scmp.lt.s32.totalorder %s582_s24, %s578_s22 }
 0x120   : > { %p580_p12 = pnand %p579_p9, %p857_p2 }
 0x121   : > { %p585_p11 = por %p584_p1, %p583_p13 }
 0x122   : > { %p581_p5 = pneg %p580_p12 }
 0x124   : > { %p586_p10 = pnand %p585_p11, %p581_p5 }
 0x126   : > { %589 = shalt.err (!%p586_p10)
}
 0x127   : > { %423 = dma.vmem_to_hbm [thread:$0]  (%p857_p2), %s305_s4, 32, %s302_s7, %s290_s8  }
 0x128 PF: > { %p445_p4 = scmp.ge.s32.totalorder %s636_s15, 2  ;;  %s316_s28 = sand.u32 1, %s624_s12  }
 0x129   : > { %p858_p6 = scmp.ne.s32.totalorder %s845_s19, 0  ;;  %s317_s18 = scalar_lea.sflag [#allocation4], %s316_s28 }
 0x12b   : > { %p437_p8 = pnand %p445_p4, %p858_p6 }
 0x12d   : > { %p438_p0 = pneg %p437_p8 }
 0x12f   : > { %619 = dma.done.wait (%p438_p0), %s317_s18, 32  }
 0x130   : > { %621 = vsyncadd (%p438_p0), %s317_s18, 4294967264  ;;  %p15_p3 = scmp.ge.s32.totalorder %s717_s26, 6   ;;  %s859_s12 = smov %s628_s13 }
 0x131   : > { %s860_s13 = smov %s632_s14  ;;  %s861_s14 = smov %s744_s9 }
 0x132   : > { %s862_s15 = smov %s717_s26  ;;  %17 = sbr.rel (!%p15_p3) target bundleno = 5 (0x5), region = 84 }
 0x137   :  { %322 = vsyncpa [#allocation3], 1 }
 0x138   :  { %324 = vsyncpa [#allocation3 + $0x1], 1 }
 0x139   :  { %325 = vsyncpa [#allocation6], 1 }
 0x13a   :  { %326 = vsyncpa [#allocation4], 1 }
 0x13b   :  { %328 = vsyncpa [#allocation4 + $0x1], 1 }

</bundles_post_ra>
